<compile_context>
chip_gen: v6e
topology: v6e:2x2x1
jax: 0.10.0
libtpu: 0.0.40
codegen_flags: <defaults>
</compile_context>

<pallas_src>
import jax
import jax.numpy as jnp
from jax.experimental import pallas as pl
from jax.experimental.pallas import tpu as pltpu


def _round_up(n, m):
    return (n + m - 1) // m * m


def _leaky_relu(x, slope=0.2):
    return jnp.where(x > 0, x, slope * x)


def discriminator_kernel(x_ref, w1_ref, b1_ref, w2_ref, b2_ref, w3_ref, b3_ref, o_ref):
    x = x_ref[...]                      # (TILE_B, nc) f32
    nc = x_ref.shape[1]

    # ---- Layer 1: Linear(nc, 128).  K = nc (= 4) is tiny, so a systolic matmul
    #      would be >96% padding; do it as nc VPU multiply-adds instead. ----
    w1 = w1_ref[...].astype(jnp.float32)             # (nc, 128)
    h1 = b1_ref[...].astype(jnp.float32)             # (1, 128) -> broadcasts over rows
    for k in range(nc):                              # static, nc known at trace time
        h1 = h1 + x[:, k:k + 1] * w1[k:k + 1, :]     # (TILE_B, 128)
    h1 = _leaky_relu(h1)

    # ---- Layer 2: Linear(128, 256).  The only real matmul: bf16 in, f32 acc on MXU. ----
    h2 = jnp.dot(h1.astype(jnp.bfloat16), w2_ref[...],
                 preferred_element_type=jnp.float32)  # (TILE_B, 256)
    h2 = _leaky_relu(h2 + b2_ref[...].astype(jnp.float32))

    # ---- Layer 3: Linear(256, 1).  N = 1 would waste 127/128 MXU lanes; use a
    #      VPU multiply + XLU lane reduce instead. ----
    w3 = w3_ref[...].astype(jnp.float32)              # (1, 256) row (PyTorch layout)
    h3 = jnp.sum(h2 * w3, axis=-1, keepdims=True) + b3_ref[...]   # (TILE_B, 1) f32

    # Sigmoid: exp + reciprocal both go to the otherwise-idle EUP slot.
    o_ref[...] = pl.reciprocal(1.0 + jnp.exp(-h3), approx=True).astype(o_ref.dtype)


def discriminator_forward(x, params, *, tile_b=512):
    """x: (B, nc) float32 -> (B, 1) float32 (matches output.view(B, -1))."""
    w1, b1, w2, b2, w3, b3 = params
    B, nc = x.shape

    # Batch tile: multiple of 8 sublanes, never larger than the (padded) batch.
    tile_b = max(8, min(_round_up(tile_b, 8), _round_up(B, 8)))
    B_pad = _round_up(B, tile_b)
    if B_pad != B:
        x = jnp.pad(x, ((0, B_pad - B), (0, 0)))
    grid = (B_pad // tile_b,)

    const = lambda i: (0, 0)   # weights/biases: DMA once, VMEM-resident across grid steps

    out = pl.pallas_call(
        discriminator_kernel,
        out_shape=jax.ShapeDtypeStruct((B_pad, 1), jnp.float32),
        grid=grid,
        in_specs=[
            pl.BlockSpec((tile_b, nc), lambda i: (i, 0)),   # x tile
            pl.BlockSpec(w1.shape, const),
            pl.BlockSpec(b1.shape, const),
            pl.BlockSpec(w2.shape, const),
            pl.BlockSpec(b2.shape, const),
            pl.BlockSpec(w3.shape, const),
            pl.BlockSpec(b3.shape, const),
        ],
        out_specs=pl.BlockSpec((tile_b, 1), lambda i: (i, 0)),
        compiler_params=pltpu.CompilerParams(
            dimension_semantics=("parallel",)),             # 2x on v7x's two TCs
    )(x, w1, b1, w2, b2, w3, b3)

    return out[:B]


def init_params(key, nc):
    """PyTorch-default-style U(-1/sqrt(fan_in), 1/sqrt(fan_in)) init.

    w1, w2 stored transposed as (in, out) so the hot path is x @ W; w3 stored as
    its natural PyTorch (1, 256) row.  Weights are bf16 (halved DMA, MXU-native),
    biases stay f32.
    """
    ks = jax.random.split(key, 6)

    def u(k, shape, fan_in):
        bound = 1.0 / float(fan_in) ** 0.5
        return jax.random.uniform(k, shape, jnp.float32, minval=-bound, maxval=bound)

    w1 = u(ks[0], (nc, 128), nc).astype(jnp.bfloat16)
    b1 = u(ks[1], (1, 128), nc)
    w2 = u(ks[2], (128, 256), 128).astype(jnp.bfloat16)
    b2 = u(ks[3], (1, 256), 128)
    w3 = u(ks[4], (1, 256), 256).astype(jnp.bfloat16)
    b3 = u(ks[5], (1, 1), 256)
    return (w1, b1, w2, b2, w3, b3)


def reference_forward(x, params):
    """Pure-JAX reference mirroring the kernel's numerics (bf16 weights, f32 acc)."""
    w1, b1, w2, b2, w3, b3 = params
    h1 = jax.nn.leaky_relu(x @ w1.astype(jnp.float32) + b1, negative_slope=0.2)
    h2 = jnp.dot(h1.astype(jnp.bfloat16), w2, preferred_element_type=jnp.float32)
    h2 = jax.nn.leaky_relu(h2 + b2, negative_slope=0.2)
    h3 = jnp.sum(h2 * w3.astype(jnp.float32), axis=-1, keepdims=True) + b3
    return jax.nn.sigmoid(h3)


if __name__ == "__main__":
    key = jax.random.PRNGKey(0)
    k_x, k_p = jax.random.split(key)

    nc = 4        # input feature dim (matches Discriminator(nc=4))
    batch = 200   # non-multiple of the tile -> exercises padding + a 2-step grid

    x = jax.random.normal(k_x, (batch, nc), dtype=jnp.float32)
    params = init_params(k_p, nc)

    out = discriminator_forward(x, params, tile_b=128)
    out = jax.block_until_ready(out)

    ref = reference_forward(x, params)
    assert out.shape == (batch, 1), out.shape
    assert jnp.allclose(out, ref, atol=2e-3), "mismatch vs reference"

    print("KERNEL_OK")
</pallas_src>

<mosaic_0001>
module attributes {stable_mosaic.version = 11 : i64} {
  func.func @discriminator_kernel(%arg0: i32, %arg1: memref<128x4xf32, #tpu.memory_space<vmem>>, %arg2: memref<4x128xbf16, #tpu.memory_space<vmem>>, %arg3: memref<1x128xf32, #tpu.memory_space<vmem>>, %arg4: memref<128x256xbf16, #tpu.memory_space<vmem>>, %arg5: memref<1x256xf32, #tpu.memory_space<vmem>>, %arg6: memref<1x256xbf16, #tpu.memory_space<vmem>>, %arg7: memref<1x1xf32, #tpu.memory_space<vmem>>, %arg8: memref<128x1xf32, #tpu.memory_space<vmem>>) attributes {dimension_semantics = [#tpu.dimension_semantics<parallel>], iteration_bounds = array<i64: 2>, scalar_prefetch = 0 : i64, scratch_operands = 0 : i64, tpu.core_type = #tpu.core_type<tc>, window_params = [{transform_indices = @transform_0, window_bounds = array<i64: 128, 4>}, {pipeline_mode = #tpu.pipeline_mode<synchronous>, transform_indices = @transform_1, window_bounds = array<i64: 4, 128>}, {pipeline_mode = #tpu.pipeline_mode<synchronous>, transform_indices = @transform_2, window_bounds = array<i64: 1, 128>}, {pipeline_mode = #tpu.pipeline_mode<synchronous>, transform_indices = @transform_3, window_bounds = array<i64: 128, 256>}, {pipeline_mode = #tpu.pipeline_mode<synchronous>, transform_indices = @transform_4, window_bounds = array<i64: 1, 256>}, {pipeline_mode = #tpu.pipeline_mode<synchronous>, transform_indices = @transform_5, window_bounds = array<i64: 1, 256>}, {pipeline_mode = #tpu.pipeline_mode<synchronous>, transform_indices = @transform_6, window_bounds = array<i64: 1, 1>}, {transform_indices = @transform_7, window_bounds = array<i64: 128, 1>}]} {
    %c0 = arith.constant 0 : index
    %c0_0 = arith.constant 0 : index
    %0 = vector.load %arg1[%c0, %c0_0] : memref<128x4xf32, #tpu.memory_space<vmem>>, vector<128x4xf32>
    %c0_1 = arith.constant 0 : index
    %c0_2 = arith.constant 0 : index
    %1 = vector.load %arg2[%c0_1, %c0_2] : memref<4x128xbf16, #tpu.memory_space<vmem>>, vector<4x128xbf16>
    %2 = arith.extf %1 : vector<4x128xbf16> to vector<4x128xf32>
    %c0_3 = arith.constant 0 : index
    %c0_4 = arith.constant 0 : index
    %3 = vector.load %arg3[%c0_3, %c0_4] : memref<1x128xf32, #tpu.memory_space<vmem>>, vector<1x128xf32>
    %4 = vector.extract_strided_slice %0 {offsets = [0, 0], sizes = [128, 1], strides = [1, 1]} : vector<128x4xf32> to vector<128x1xf32>
    %5 = vector.extract_strided_slice %2 {offsets = [0, 0], sizes = [1, 128], strides = [1, 1]} : vector<4x128xf32> to vector<1x128xf32>
    %6 = vector.broadcast %4 : vector<128x1xf32> to vector<128x128xf32>
    %7 = vector.broadcast %5 : vector<1x128xf32> to vector<128x128xf32>
    %8 = arith.mulf %6, %7 : vector<128x128xf32>
    %9 = vector.broadcast %3 : vector<1x128xf32> to vector<128x128xf32>
    %10 = arith.addf %9, %8 : vector<128x128xf32>
    %11 = vector.extract_strided_slice %0 {offsets = [0, 1], sizes = [128, 1], strides = [1, 1]} : vector<128x4xf32> to vector<128x1xf32>
    %12 = vector.extract_strided_slice %2 {offsets = [1, 0], sizes = [1, 128], strides = [1, 1]} : vector<4x128xf32> to vector<1x128xf32>
    %13 = vector.broadcast %11 : vector<128x1xf32> to vector<128x128xf32>
    %14 = vector.broadcast %12 : vector<1x128xf32> to vector<128x128xf32>
    %15 = arith.mulf %13, %14 : vector<128x128xf32>
    %16 = arith.addf %10, %15 : vector<128x128xf32>
    %17 = vector.extract_strided_slice %0 {offsets = [0, 2], sizes = [128, 1], strides = [1, 1]} : vector<128x4xf32> to vector<128x1xf32>
    %18 = vector.extract_strided_slice %2 {offsets = [2, 0], sizes = [1, 128], strides = [1, 1]} : vector<4x128xf32> to vector<1x128xf32>
    %19 = vector.broadcast %17 : vector<128x1xf32> to vector<128x128xf32>
    %20 = vector.broadcast %18 : vector<1x128xf32> to vector<128x128xf32>
    %21 = arith.mulf %19, %20 : vector<128x128xf32>
    %22 = arith.addf %16, %21 : vector<128x128xf32>
    %23 = vector.extract_strided_slice %0 {offsets = [0, 3], sizes = [128, 1], strides = [1, 1]} : vector<128x4xf32> to vector<128x1xf32>
    %24 = vector.extract_strided_slice %2 {offsets = [3, 0], sizes = [1, 128], strides = [1, 1]} : vector<4x128xf32> to vector<1x128xf32>
    %25 = vector.broadcast %23 : vector<128x1xf32> to vector<128x128xf32>
    %26 = vector.broadcast %24 : vector<1x128xf32> to vector<128x128xf32>
    %27 = arith.mulf %25, %26 : vector<128x128xf32>
    %28 = arith.addf %22, %27 : vector<128x128xf32>
    %cst = arith.constant 0.000000e+00 : f32
    %29 = vector.broadcast %cst : f32 to vector<128x128xf32>
    %30 = arith.cmpf ogt, %28, %29 : vector<128x128xf32>
    %cst_5 = arith.constant 2.000000e-01 : f32
    %31 = vector.broadcast %cst_5 : f32 to vector<128x128xf32>
    %32 = arith.mulf %31, %28 : vector<128x128xf32>
    %33 = arith.select %30, %28, %32 : vector<128x128xi1>, vector<128x128xf32>
    %34 = arith.truncf %33 : vector<128x128xf32> to vector<128x128xbf16>
    %c0_6 = arith.constant 0 : index
    %c0_7 = arith.constant 0 : index
    %35 = vector.load %arg4[%c0_6, %c0_7] : memref<128x256xbf16, #tpu.memory_space<vmem>>, vector<128x256xbf16>
    %cst_8 = arith.constant dense<0.000000e+00> : vector<128x256xf32>
    %36 = tpu.matmul %34, %35, %cst_8 {dimension_numbers = #tpu.dot_dimension_numbers<[1], [0], [0], [1], [0, 0, 1, 1], [], []>} : vector<128x128xbf16>, vector<128x256xbf16>, vector<128x256xf32> -> vector<128x256xf32>
    %c0_9 = arith.constant 0 : index
    %c0_10 = arith.constant 0 : index
    %37 = vector.load %arg5[%c0_9, %c0_10] : memref<1x256xf32, #tpu.memory_space<vmem>>, vector<1x256xf32>
    %38 = vector.broadcast %37 : vector<1x256xf32> to vector<128x256xf32>
    %39 = arith.addf %36, %38 : vector<128x256xf32>
    %cst_11 = arith.constant 0.000000e+00 : f32
    %40 = vector.broadcast %cst_11 : f32 to vector<128x256xf32>
    %41 = arith.cmpf ogt, %39, %40 : vector<128x256xf32>
    %cst_12 = arith.constant 2.000000e-01 : f32
    %42 = vector.broadcast %cst_12 : f32 to vector<128x256xf32>
    %43 = arith.mulf %42, %39 : vector<128x256xf32>
    %44 = arith.select %41, %39, %43 : vector<128x256xi1>, vector<128x256xf32>
    %c0_13 = arith.constant 0 : index
    %c0_14 = arith.constant 0 : index
    %45 = vector.load %arg6[%c0_13, %c0_14] : memref<1x256xbf16, #tpu.memory_space<vmem>>, vector<1x256xbf16>
    %46 = arith.extf %45 : vector<1x256xbf16> to vector<1x256xf32>
    %47 = vector.broadcast %46 : vector<1x256xf32> to vector<128x256xf32>
    %48 = arith.mulf %44, %47 : vector<128x256xf32>
    %cst_15 = arith.constant dense<0.000000e+00> : vector<128xf32>
    %49 = vector.multi_reduction <add>, %48, %cst_15 [1] : vector<128x256xf32> to vector<128xf32>
    %50 = vector.shape_cast %49 : vector<128xf32> to vector<128x1xf32>
    %c0_16 = arith.constant 0 : index
    %c0_17 = arith.constant 0 : index
    %51 = vector.load %arg7[%c0_16, %c0_17] : memref<1x1xf32, #tpu.memory_space<vmem>>, vector<1x1xf32>
    %52 = vector.broadcast %51 : vector<1x1xf32> to vector<128x1xf32>
    %53 = arith.addf %50, %52 : vector<128x1xf32>
    %cst_18 = arith.constant 0.000000e+00 : f32
    %54 = vector.broadcast %cst_18 : f32 to vector<128x1xf32>
    %55 = arith.subf %54, %53 : vector<128x1xf32>
    %56 = math.exp %55 : vector<128x1xf32>
    %cst_19 = arith.constant 1.000000e+00 : f32
    %57 = vector.broadcast %cst_19 : f32 to vector<128x1xf32>
    %58 = arith.addf %57, %56 : vector<128x1xf32>
    %59 = tpu.reciprocal %58 {approx = true} : vector<128x1xf32> -> vector<128x1xf32>
    %c0_20 = arith.constant 0 : index
    %c0_21 = arith.constant 0 : index
    %60 = vector.load %arg8[%c0_20, %c0_21] : memref<128x1xf32, #tpu.memory_space<vmem>>, vector<128x1xf32>
    tpu.vector_store %arg8[%c0_20, %c0_21], %59 {strides = array<i32>} : memref<128x1xf32, #tpu.memory_space<vmem>>, vector<128x1xf32>,
    return
  }
  func.func @transform_0(%arg0: i32) -> (i32, i32) {
    %c0_i32 = arith.constant 0 : i32
    %c0_i32_0 = arith.constant 0 : i32
    return %arg0, %c0_i32 : i32, i32
  }
  func.func @transform_1(%arg0: i32) -> (i32, i32) {
    %c0_i32 = arith.constant 0 : i32
    %c0_i32_0 = arith.constant 0 : i32
    %c0_i32_1 = arith.constant 0 : i32
    return %c0_i32, %c0_i32_0 : i32, i32
  }
  func.func @transform_2(%arg0: i32) -> (i32, i32) {
    %c0_i32 = arith.constant 0 : i32
    %c0_i32_0 = arith.constant 0 : i32
    %c0_i32_1 = arith.constant 0 : i32
    return %c0_i32, %c0_i32_0 : i32, i32
  }
  func.func @transform_3(%arg0: i32) -> (i32, i32) {
    %c0_i32 = arith.constant 0 : i32
    %c0_i32_0 = arith.constant 0 : i32
    %c0_i32_1 = arith.constant 0 : i32
    return %c0_i32, %c0_i32_0 : i32, i32
  }
  func.func @transform_4(%arg0: i32) -> (i32, i32) {
    %c0_i32 = arith.constant 0 : i32
    %c0_i32_0 = arith.constant 0 : i32
    %c0_i32_1 = arith.constant 0 : i32
    return %c0_i32, %c0_i32_0 : i32, i32
  }
  func.func @transform_5(%arg0: i32) -> (i32, i32) {
    %c0_i32 = arith.constant 0 : i32
    %c0_i32_0 = arith.constant 0 : i32
    %c0_i32_1 = arith.constant 0 : i32
    return %c0_i32, %c0_i32_0 : i32, i32
  }
  func.func @transform_6(%arg0: i32) -> (i32, i32) {
    %c0_i32 = arith.constant 0 : i32
    %c0_i32_0 = arith.constant 0 : i32
    %c0_i32_1 = arith.constant 0 : i32
    return %c0_i32, %c0_i32_0 : i32, i32
  }
  func.func @transform_7(%arg0: i32) -> (i32, i32) {
    %c0_i32 = arith.constant 0 : i32
    %c0_i32_0 = arith.constant 0 : i32
    return %arg0, %c0_i32 : i32, i32
  }
}

</mosaic_0001>

<bundles_post_ra>
// kernel: tpu_custom_call.1
= control target key start
LH: loop header
LB: loop body
LE: loop exit
PB: predicated region body
PF: predicated region fallthrough
CT: control target
= control target key end

     0   :  { %s1596_s26 = smov 0   ;;  %s2077_s0 = inlined_call_operand.vmem [shape: f32[256,4], index: 0, kind: input, shape index: {}]   ;;  %s2078_s1 = inlined_call_operand.vmem [shape: bf16[4,128], index: 1, kind: input, shape index: {}]   ;;  %s2079_s2 = inlined_call_operand.vmem [shape: f32[1,128], index: 2, kind: input, shape index: {}]   ;;  %s2080_s3 = inlined_call_operand.vmem [shape: bf16[128,256], index: 3, kind: input, shape index: {}]   ;;  %s2081_s4 = inlined_call_operand.vmem [shape: f32[1,256], index: 4, kind: input, shape index: {}]   ;;  %s2082_s5 = inlined_call_operand.vmem [shape: bf16[1,256], index: 5, kind: input, shape index: {}]   ;;  %s2083_s6 = inlined_call_operand.<no memory space> [shape: f32[1,1], index: 6, kind: input, shape index: {}]   ;;  %s2084_s7 = inlined_call_operand.vmem [shape: f32[256,1], index: 7, kind: output, shape index: {}]  }
   0x1   :  { %v12_v0 = vstv %s2083_s6 }
   0x2   :  { %13 = vst [vmem:[#allocation2] sm:$0x1] %v12_v0 }
   0x3 LB: > { %s1376_s27 = sadd.s32 4294967295, %s1547_s26   ;;  %p1380_p0 = scmp.ge.s32.totalorder %s1547_s26, 1  ;;  %s1547_s26 = sphi %s1596_s26, %s19_s26  }
   0x4   : > { %p240_p1 = scmp.lt.s32.totalorder %s1547_s26, 3 }
   0x6   : > { %p241_p2 = pnand %p1380_p0, %p240_p1 }
   0x7   : > { %s1381_s28 = sshll.u32 (!%p241_p2), %s1376_s27, 4 }
   0x8   : > { %244 = sbr.rel (%p241_p2) target bundleno = 701 (0x2bd), region = 48  ;;  %p273_p3 = scmp.lt.s32.totalorder (!%p241_p2), %s1381_s28, 31 }
   0xd   : > { %v1549_v1 = vmov 0   ;;  %s2086_s28 = smov (!%p273_p3, %s1381_s28), 31  ;;  %v1550_v7 = vmov 1   ;;  %v1551_v10 = vmov 2   ;;  %v1552_v12 = vmov 3  }
   0xe   : > { %1434 = vset.pattern.permute.xlu1 %v1549_v1  ;;  %1433 = vset.pattern.permute.xlu0 %v1549_v1  ;;  %s1382_s6 = sshll.u32 %s2086_s28, 3  ;;  %v1453_v18 = vld [vmem:[%s2080_s3 + $0x74] ss:$8 sps:$4 sm:$0xff]   ;;  %v1455_v19 = vld [vmem:[%s2080_s3 + $0x70] ss:$8 sps:$4 sm:$0xff]   ;;  %v384_v58 = vlaneseq }
   0xf   : > { %922 = vmatprep.mubr.bf16.mxu0 %v1549_v1  ;;  %962 = vmatprep.mubr.bf16.mxu1 %v1549_v1  ;;  %s1616_s8 = scalar_lea.vmem %s2077_s0, %s1382_s6  ;;  %v1456_v21 = vld [vmem:[%s2080_s3 + $0x64] ss:$8 sps:$4 sm:$0xff]   ;;  %v1458_v22 = vld [vmem:[%s2080_s3 + $0x60] ss:$8 sps:$4 sm:$0xff]   ;;  %v1459_v23 = vld [vmem:[%s2080_s3 + $0x54] ss:$8 sps:$4 sm:$0xff]   ;;  %s2032_s10 = scalar_lea.vmem %s2084_s7, %s1382_s6 }
  0x10   : > { %v293_v2 = vld [vmem:[%s1616_s8 + $0x40] sm:$0xff]  ;;  %v1624_v4 = vld [vmem:[%s1616_s8 + $0x48] sm:$0xff]  ;;  %v1629_v6 = vld [vmem:[%s1616_s8 + $0x18] sm:$0xff]  ;;  %890 = vmatprep.subr.bf16.mxu0 %v1453_v18  ;;  %1405 = vmatprep.subr.bf16.mxu1 %v1453_v18  ;;  %v1790_v61 = vshrl.u32 %v384_v58, 7 }
  0x11   : > { %v1620_v3 = vld [vmem:[%s1616_s8] sm:$0xff]  ;;  %346 = vperm.xlu1 %1434, %v293_v2   ;;  %v286_v5 = vld [vmem:[%s1616_s8 + $0x8] sm:$0xff]  ;;  %v1638_v9 = vld [vmem:[%s1616_s8 + $0x38] sm:$0xff]  ;;  %891 = vmatpush1.bf16.msra.mxu0 %v1455_v19 }
  0x12   : > { %306 = vperm.xlu0 %1433, %v1620_v3   ;;  %v1634_v8 = vld [vmem:[%s1616_s8 + $0x28] sm:$0xff]  ;;  %v1648_v11 = vld [vmem:[%s1616_s8 + $0x10] sm:$0xff]  ;;  %v1653_v13 = vld [vmem:[%s1616_s8 + $0x58] sm:$0xff]  ;;  %1413 = vmatpush1.bf16.msra.mxu1 %v1455_v19 }
  0x13   : > { %v1657_v14 = vld [vmem:[%s1616_s8 + $0x20] sm:$0xff]  ;;  %v1661_v15 = vld [vmem:[%s1616_s8 + $0x68] sm:$0xff]  ;;  %v1667_v16 = vld [vmem:[%s1616_s8 + $0x50] sm:$0xff]  ;;  %892 = vmatprep.subr.bf16.mxu0 %v1456_v21  ;;  %1406 = vmatprep.subr.bf16.mxu1 %v1456_v21 }
  0x14   : > { %v1670_v17 = vld [vmem:[%s1616_s8 + $0x30] sm:$0xff]  ;;  %v1681_v20 = vld [vmem:[%s1616_s8 + $0x78] sm:$0xff]  ;;  %v1462_v25 = vld [vmem:[%s2080_s3 + $0x44] ss:$8 sps:$4 sm:$0xff]  }
  0x15   : > { %351 = vperm.xlu1 %1434, %v1624_v4   ;;  %893 = vmatpush1.bf16.msra.mxu0 %v1458_v22  ;;  %v1461_v24 = vld [vmem:[%s2080_s3 + $0x50] ss:$8 sps:$4 sm:$0xff]   ;;  %v1464_v26 = vld [vmem:[%s2080_s3 + $0x40] ss:$8 sps:$4 sm:$0xff]   ;;  %v1465_v27 = vld [vmem:[%s2080_s3 + $0x34] ss:$8 sps:$4 sm:$0xff]  }
  0x16   : > { %311 = vperm.xlu0 %1433, %v286_v5   ;;  %1414 = vmatpush1.bf16.msra.mxu1 %v1458_v22  ;;  %v1467_v28 = vld [vmem:[%s2080_s3 + $0x30] ss:$8 sps:$4 sm:$0xff]   ;;  %v1468_v29 = vld [vmem:[%s2080_s3 + $0x24] ss:$8 sps:$4 sm:$0xff]   ;;  %v1470_v30 = vld [vmem:[%s2080_s3 + $0x20] ss:$8 sps:$4 sm:$0xff]  }
  0x17   : > { %894 = vmatprep.subr.bf16.mxu0 %v1459_v23  ;;  %1407 = vmatprep.subr.bf16.mxu1 %v1459_v23  ;;  %v1471_v31 = vld [vmem:[%s2080_s3 + $0x14] ss:$8 sps:$4 sm:$0xff]   ;;  %v1473_v32 = vld [vmem:[%s2080_s3 + $0x10] ss:$8 sps:$4 sm:$0xff]   ;;  %v1474_v33 = vld [vmem:[%s2080_s3 + $0x4] ss:$8 sps:$4 sm:$0xff]  }
  0x18   : > { %v1476_v34 = vld [vmem:[%s2080_s3] ss:$8 sps:$4 sm:$0xff]   ;;  %v299_v40 = vld [vmem:[%s1616_s8 + $0x70] sm:$0xff] }
  0x19   : > { %1435 = vset.pattern.permute.xlu1 %v1550_v7  ;;  %895 = vmatpush1.bf16.msra.mxu0 %v1461_v24  ;;  %v297_v35 = vld [vmem:[%s1616_s8 + $0x60] sm:$0xff] }
  0x1a   : > { %321 = vperm.xlu0 %1433, %v1629_v6   ;;  %431 = vperm.xlu1 %1435, %v286_v5   ;;  %v301_v62 = vld [vmem:[%s2078_s1] sm:$0x3] }
  0x1b   : > { %896 = vmatprep.subr.bf16.mxu0 %v1462_v25  ;;  %1415 = vmatpush1.bf16.msra.mxu1 %v1461_v24 }
  0x1c   : > { %1408 = vmatprep.subr.bf16.mxu1 %v1462_v25 }
  0x1d   : > { %897 = vmatpush1.bf16.msra.mxu0 %v1464_v26 }
  0x1e   : > { %331 = vperm.xlu0 %1433, %v1634_v8   ;;  %459 = vperm.xlu1 %1435, %v293_v2  }
  0x1f   : > { %898 = vmatprep.subr.bf16.mxu0 %v1465_v27  ;;  %1416 = vmatpush1.bf16.msra.mxu1 %v1464_v26 }
  0x20   : > { %1409 = vmatprep.subr.bf16.mxu1 %v1465_v27 }
  0x21   : > { %899 = vmatpush1.bf16.msra.mxu0 %v1467_v28 }
  0x22   : > { %341 = vperm.xlu0 %1433, %v1638_v9   ;;  %1436 = vset.pattern.permute.xlu1 %v1551_v10 }
  0x23   : > { %527 = vperm.xlu1 %1436, %v1620_v3   ;;  %900 = vmatprep.subr.bf16.mxu0 %v1468_v29 }
  0x24   : > { %1417 = vmatpush1.bf16.msra.mxu1 %v1467_v28 }
  0x25   : > { %1410 = vmatprep.subr.bf16.mxu1 %v1468_v29  ;;  %901 = vmatpush1.bf16.msra.mxu0 %v1470_v30 }
  0x26   : > { %1447 = vset.pattern.permute.xlu0 %v1550_v7  ;;  %902 = vmatprep.subr.bf16.mxu0 %v1471_v31 }
  0x27   : > { %427 = vperm.xlu0 %1447, %v1620_v3   ;;  %559 = vperm.xlu1 %1436, %v293_v2  }
  0x28   : > { %1418 = vmatpush1.bf16.msra.mxu1 %v1470_v30 }
  0x29   : > { %1411 = vmatprep.subr.bf16.mxu1 %v1471_v31  ;;  %903 = vmatpush1.bf16.msra.mxu0 %v1473_v32 }
  0x2a   : > { %904 = vmatprep.subr.bf16.mxu0 %v1474_v33 }
  0x2b   : > { %463 = vperm.xlu0 %1447, %v1624_v4   ;;  %563 = vperm.xlu1 %1436, %v1624_v4  }
  0x2c   : > { %1419 = vmatpush1.bf16.msra.mxu1 %v1473_v32 }
  0x2d   : > { %1412 = vmatprep.subr.bf16.mxu1 %v1474_v33  ;;  %905 = vmatpush1.bf16.msra.mxu0 %v1476_v34 }
  0x2f   : > { %435 = vperm.xlu0 %1447, %v1648_v11   ;;  %1437 = vset.pattern.permute.xlu1 %v1552_v12 }
  0x30   : > { %631 = vperm.xlu1 %1437, %v286_v5   ;;  %1420 = vmatpush1.bf16.msra.mxu1 %v1476_v34 }
  0x33   : > { %471 = vperm.xlu0 %1447, %v1653_v13  }
  0x34   : > { %659 = vperm.xlu1 %1437, %v293_v2   ;;  %v302_v2 = vunpack.c.l.bf16 %v301_v62 }
  0x37   : > { %443 = vperm.xlu0 %1447, %v1657_v14  }
  0x38   : > { %1438 = vset.pattern.permute.xlu1 %v1549_v1 }
  0x39   : > { %316 = vperm.xlu1 %1438, %v1648_v11  }
  0x3b   : > { %479 = vperm.xlu0 %1447, %v1661_v15  }
  0x3d   : > { %356 = vperm.xlu1 %1438, %v1667_v16  }
  0x3f   : > { %451 = vperm.xlu0 %1447, %v1670_v17  }
  0x41   : > { %361 = vperm.xlu1 %1438, %v1653_v13  }
  0x43   : > { %487 = vperm.xlu0 %1447, %v1681_v20  }
  0x45   : > { %1439 = vset.pattern.permute.xlu1 %v1550_v7 }
  0x46   : > { %439 = vperm.xlu1 %1439, %v1629_v6  }
  0x47   : > { %1449 = vset.pattern.permute.xlu0 %v1551_v10 }
  0x48   : > { %531 = vperm.xlu0 %1449, %v286_v5  }
  0x4a   : > { %467 = vperm.xlu1 %1439, %v1667_v16  }
  0x4c   : > { %539 = vperm.xlu0 %1449, %v1629_v6  }
  0x4e   : > { %1440 = vset.pattern.permute.xlu1 %v1551_v10 }
  0x4f   : > { %535 = vperm.xlu1 %1440, %v1648_v11  }
  0x50   : > { %547 = vperm.xlu0 %1449, %v1634_v8  }
  0x53   : > { %567 = vperm.xlu1 %1440, %v1667_v16  }
  0x54   : > { %555 = vperm.xlu0 %1449, %v1638_v9  }
  0x57   : > { %571 = vperm.xlu1 %1440, %v1653_v13  }
  0x58   : > { %1451 = vset.pattern.permute.xlu0 %v1552_v12 }
  0x59   : > { %627 = vperm.xlu0 %1451, %v1620_v3   ;;  %v1798_v3 = vsub.s32 0, %v1790_v61 }
  0x5b   : > { %1441 = vset.pattern.permute.xlu1 %v1552_v12 }
  0x5c   : > { %639 = vperm.xlu1 %1441, %v1629_v6   ;;  %v1802_v6 = vrot.slane %v302_v2, %v1798_v3 }
  0x5d   : > { %663 = vperm.xlu0 %1451, %v1624_v4   ;;  %v492_v4 = vsub.s32 1, %v1790_v61 }
  0x60   : > { %667 = vperm.xlu1 %1441, %v1667_v16  }
  0x61   : > { %635 = vperm.xlu0 %1451, %v1648_v11  }
  0x64   : > { %1442 = vset.pattern.permute.xlu1 %v1549_v1 }
  0x65   : > { %671 = vperm.xlu0 %1451, %v1653_v13   ;;  %326 = vperm.xlu1 %1442, %v1657_v14   ;;  %v1813_v13 = vld [vmem:[%s2079_s2] ss:$0 sm:$0xff] }
  0x69   : > { %643 = vperm.xlu0 %1451, %v1657_v14   ;;  %366 = vperm.xlu1 %1442, %v297_v35  }
  0x6d   : > { %679 = vperm.xlu0 %1451, %v1661_v15   ;;  %371 = vperm.xlu1 %1442, %v1661_v15  }
  0x71   : > { %651 = vperm.xlu0 %1451, %v1670_v17   ;;  %1443 = vset.pattern.permute.xlu1 %v1550_v7 }
  0x72   : > { %447 = vperm.xlu1 %1443, %v1634_v8  }
  0x75   : > { %687 = vperm.xlu0 %1451, %v1681_v20  }
  0x76   : > { %475 = vperm.xlu1 %1443, %v297_v35  }
  0x7a   : > { %1444 = vset.pattern.permute.xlu1 %v1551_v10 }
  0x7b   : > { %543 = vperm.xlu1 %1444, %v1657_v14  }
  0x7f   : > { %575 = vperm.xlu1 %1444, %v297_v35  }
  0x83   : > { %579 = vperm.xlu1 %1444, %v1661_v15   ;;  %v692_v15 = vsub.s32 3, %v1790_v61 }
  0x85   : > { %v1831_v27 = vrot.slane %v302_v2, %v692_v15 }
  0x87   : > { %1445 = vset.pattern.permute.xlu1 %v1552_v12 }
  0x88   : > { %647 = vperm.xlu1 %1445, %v1634_v8  }
  0x8c   : > { %v347_v36 = vpop.permute.xlu1 %346  ;;  %675 = vperm.xlu1 %1445, %v297_v35  }
  0x8d   : > { %v307_v37 = vpop.permute.xlu0 %306  ;;  %v396_v14 = vmul.f32 %v1802_v6, %v347_v36 }
  0x8e   : > { %v388_v16 = vmul.f32 %v1802_v6, %v307_v37 }
  0x8f   : > { %v418_v25 = vadd.f32 %v1813_v13, %v396_v14 }
  0x90   : > { %v352_v38 = vpop.permute.xlu1 %351  ;;  %1446 = vset.pattern.permute.xlu1 %v1549_v1  ;;  %v410_v28 = vadd.f32 %v1813_v13, %v388_v16 }
  0x91   : > { %v312_v39 = vpop.permute.xlu0 %311  ;;  %336 = vperm.xlu1 %1446, %v1670_v17   ;;  %v397_v21 = vmul.f32 %v1802_v6, %v352_v38 }
  0x92   : > { %v389_v8 = vmul.f32 %v1802_v6, %v312_v39 }
  0x93   : > { %v419_v34 = vadd.f32 %v1813_v13, %v397_v21 }
  0x95   : > { %v1764_v41 = vpop.permute.xlu0 %321  ;;  %v432_v42 = vpop.permute.xlu1 %431  ;;  %376 = vperm.xlu1 %1446, %v299_v40  }
  0x96   : > { %v391_v38 = vmul.f32 %v1802_v6, %v1764_v41 }
  0x98   : > { %v413_v62 = vadd.f32 %v1813_v13, %v391_v38 }
  0x99   : > { %v1766_v43 = vpop.permute.xlu0 %331  ;;  %v460_v44 = vpop.permute.xlu1 %459  ;;  %381 = vperm.xlu1 %1446, %v1681_v20  }
  0x9d   : > { %v1769_v45 = vpop.permute.xlu0 %341  ;;  %1448 = vset.pattern.permute.xlu1 %v1550_v7 }
  0x9e   : > { %455 = vperm.xlu1 %1448, %v1638_v9   ;;  %v1773_v46 = vpop.permute.xlu1 %527 }
  0xa2   : > { %v428_v47 = vpop.permute.xlu0 %427  ;;  %483 = vperm.xlu1 %1448, %v299_v40   ;;  %v560_v48 = vpop.permute.xlu1 %559 }
  0xa6   : > { %v464_v49 = vpop.permute.xlu0 %463  ;;  %1450 = vset.pattern.permute.xlu1 %v1551_v10  ;;  %v564_v50 = vpop.permute.xlu1 %563  ;;  %v592_v10 = vsub.s32 2, %v1790_v61 }
  0xa7   : > { %551 = vperm.xlu1 %1450, %v1670_v17   ;;  %v411_v17 = vadd.f32 %v1813_v13, %v389_v8 }
  0xa8   : > { %v1822_v19 = vrot.slane %v302_v2, %v592_v10 }
  0xaa   : > { %v1777_v51 = vpop.permute.xlu0 %435  ;;  %v602_v26 = vmul.f32 %v1822_v19, %v560_v48 }
  0xab   : > { %583 = vperm.xlu1 %1450, %v299_v40   ;;  %v632_v52 = vpop.permute.xlu1 %631 }
  0xae   : > { %v1779_v53 = vpop.permute.xlu0 %471 }
  0xaf   : > { %587 = vperm.xlu1 %1450, %v1681_v20   ;;  %v660_v54 = vpop.permute.xlu1 %659 }
  0xb0   : > { %v702_v33 = vmul.f32 %v1831_v27, %v660_v54 }
  0xb2   : > { %v1782_v55 = vpop.permute.xlu0 %443 }
  0xb3   : > { %1452 = vset.pattern.permute.xlu1 %v1552_v12 }
  0xb4   : > { %655 = vperm.xlu1 %1452, %v1638_v9   ;;  %v317_v56 = vpop.permute.xlu1 %316  ;;  %v1807_v9 = vrot.slane %v302_v2, %v492_v4 }
  0xb5   : > { %v390_v2 = vmul.f32 %v1802_v6, %v317_v56 }
  0xb6   : > { %v1786_v57 = vpop.permute.xlu0 %479  ;;  %v495_v18 = vmul.f32 %v1807_v9, %v432_v42  ;;  %v502_v20 = vmul.f32 %v1807_v9, %v460_v44  ;;  %v494_v30 = vmul.f32 %v1807_v9, %v428_v47  ;;  %v503_v31 = vmul.f32 %v1807_v9, %v464_v49 }
  0xb7   : > { %v603_v44 = vmul.f32 %v1822_v19, %v564_v50  ;;  %v695_v47 = vmul.f32 %v1831_v27, %v632_v52  ;;  %v594_v49 = vmul.f32 %v1822_v19, %v1773_v46  ;;  %v496_v14 = vmul.f32 %v1807_v9, %v1777_v51 }
  0xb8   : > { %683 = vperm.xlu1 %1452, %v299_v40   ;;  %v357_v59 = vpop.permute.xlu1 %356  ;;  %v511_v29 = vadd.f32 %v495_v18, %v411_v17  ;;  %v518_v32 = vadd.f32 %v502_v20, %v418_v25  ;;  %v510_v40 = vadd.f32 %v494_v30, %v410_v28  ;;  %v519_v42 = vadd.f32 %v503_v31, %v419_v34 }
  0xb9   : > { %v505_v15 = vmul.f32 %v1807_v9, %v1779_v53  ;;  %v398_v46 = vmul.f32 %v1802_v6, %v357_v59  ;;  %v412_v20 = vadd.f32 %v1813_v13, %v390_v2 }
  0xba   : > { %v1788_v60 = vpop.permute.xlu0 %451  ;;  %v618_v39 = vadd.f32 %v602_v26, %v518_v32  ;;  %v619_v8 = vadd.f32 %v603_v44, %v519_v42  ;;  %v610_v50 = vadd.f32 %v594_v49, %v510_v40 }
  0xbb   : > { %v512_v34 = vadd.f32 %v496_v14, %v412_v20 }
  0xbc   : > { %v362_v63 = vpop.permute.xlu1 %361  ;;  %v718_v48 = vadd.f32 %v702_v33, %v618_v39 }
  0xbd   : > { %v399_v56 = vmul.f32 %v1802_v6, %v362_v63 }
  0xbe   : > { %v1795_v0 = vpop.permute.xlu0 %487  ;;  %vm734_vm0 = vcmp.gt.f32.partialorder %v718_v48, 0.0  ;;  %v750_v17 = vmul.f32 0.2, %v718_v48 }
  0xbf   : > { %v421_v30 = vadd.f32 %v1813_v13, %v399_v56 }
  0xc1   : > { %v440_v5 = vpop.permute.xlu1 %439 }
  0xc3   : > { %v532_v7 = vpop.permute.xlu0 %531 }
  0xc4   : > { %v595_v22 = vmul.f32 %v1822_v19, %v532_v7  ;;  %v497_v7 = vmul.f32 %v1807_v9, %v440_v5 }
  0xc5   : > { %v468_v11 = vpop.permute.xlu1 %467 }
  0xc6   : > { %v611_v35 = vadd.f32 %v595_v22, %v511_v29  ;;  %v513_v21 = vadd.f32 %v497_v7, %v413_v62  ;;  %v504_v51 = vmul.f32 %v1807_v9, %v468_v11  ;;  %v521_v62 = vadd.f32 %v505_v15, %v421_v30 }
  0xc7   : > { %v540_v12 = vpop.permute.xlu0 %539  ;;  %v393_v30 = vmul.f32 %v1802_v6, %v1766_v43 }
  0xc8   : > { %v711_v54 = vadd.f32 %v695_v47, %v611_v35  ;;  %v597_v16 = vmul.f32 %v1822_v19, %v540_v12  ;;  %v420_v12 = vadd.f32 %v1813_v13, %v398_v46 }
  0xca   : > { %v536_v23 = vpop.permute.xlu1 %535  ;;  %v743_v5 = vmul.f32 0.2, %v711_v54  ;;  %vm727_vm1 = vcmp.gt.f32.partialorder %v711_v54, 0.0  ;;  %v613_v28 = vadd.f32 %v597_v16, %v513_v21  ;;  %v520_v33 = vadd.f32 %v504_v51, %v420_v12 }
  0xcb   : > { %v1827_v24 = vpop.permute.xlu0 %547  ;;  %v596_v63 = vmul.f32 %v1822_v19, %v536_v23 }
  0xcc   : > { %v759_v32 = vsel %vm727_vm1, %v711_v54, %v743_v5  ;;  %v766_v54 = vsel %vm734_vm0, %v718_v48, %v750_v17 }
  0xcd   : > { %v612_v47 = vadd.f32 %v596_v63, %v512_v34 }
  0xce   : > { %v568_v36 = vpop.permute.xlu1 %567 }
  0xcf   : > { %v1838_v37 = vpop.permute.xlu0 %555  ;;  %v604_v29 = vmul.f32 %v1822_v19, %v568_v36 }
  0xd1   : > { %v620_v49 = vadd.f32 %v604_v29, %v520_v33 }
  0xd2   : > { %v572_v58 = vpop.permute.xlu1 %571 }
  0xd3   : > { %v605_v42 = vmul.f32 %v1822_v19, %v572_v58 }
  0xd4   : > { %v628_v41 = vpop.permute.xlu0 %627 }
  0xd5   : > { %v694_v52 = vmul.f32 %v1831_v27, %v628_v41 }
  0xd7   : > { %v710_v18 = vadd.f32 %v694_v52, %v610_v50  ;;  %v640_v22 = vpop.permute.xlu1 %639  ;;  %v621_v50 = vadd.f32 %v605_v42, %v521_v62 }
  0xd8   : > { %v664_v25 = vpop.permute.xlu0 %663  ;;  %v697_v26 = vmul.f32 %v1831_v27, %v640_v22 }
  0xd9   : > { %vm726_vm2 = vcmp.gt.f32.partialorder %v710_v18, 0.0  ;;  %v742_v53 = vmul.f32 0.2, %v710_v18  ;;  %v703_v59 = vmul.f32 %v1831_v27, %v664_v25 }
  0xda   : > { %v713_v35 = vadd.f32 %v697_v26, %v613_v28  ;;  %v498_v28 = vmul.f32 %v1807_v9, %v1782_v55  ;;  %v507_v55 = vmul.f32 %v1807_v9, %v1786_v57 }
  0xdb   : > { %v719_v31 = vadd.f32 %v703_v59, %v619_v8  ;;  %v758_v11 = vsel %vm726_vm2, %v710_v18, %v742_v53  ;;  %v668_v38 = vpop.permute.xlu1 %667 }
  0xdc   : > { %v636_v39 = vpop.permute.xlu0 %635  ;;  %v774_v40 = vpack.c.bf16 %v759_v32, %v758_v11  ;;  %v704_v23 = vmul.f32 %v1831_v27, %v668_v38  ;;  %v745_v7 = vmul.f32 0.2, %v713_v35  ;;  %vm729_vm4 = vcmp.gt.f32.partialorder %v713_v35, 0.0 }
  0xdd   : > { %vm735_vm3 = vcmp.gt.f32.partialorder %v719_v31, 0.0  ;;  %v751_v44 = vmul.f32 0.2, %v719_v31  ;;  %v696_v36 = vmul.f32 %v1831_v27, %v636_v39  ;;  %v415_v38 = vadd.f32 %v1813_v13, %v393_v30 }
  0xde   : > { %923 = vmatmul.mubr.bf16.vlgmr.msra.gmra.mxu0 %v774_v40  ;;  %v720_v41 = vadd.f32 %v704_v23, %v620_v49  ;;  %v761_v17 = vsel %vm729_vm4, %v713_v35, %v745_v7 }
  0xdf   : > { %v767_v2 = vsel %vm735_vm3, %v719_v31, %v751_v44  ;;  %932 = vmatprep.mubr.bf16.mxu0 %v1549_v1  ;;  %v712_v8 = vadd.f32 %v696_v36, %v612_v47  ;;  %v599_v47 = vmul.f32 %v1822_v19, %v1827_v24 }
  0xe0   : > { %v672_v14 = vpop.permute.xlu0 %671  ;;  %v778_v58 = vpack.c.bf16 %v767_v2, %v766_v54  ;;  %v327_v46 = vpop.permute.xlu1 %326  ;;  %v752_v56 = vmul.f32 0.2, %v720_v41  ;;  %vm736_vm6 = vcmp.gt.f32.partialorder %v720_v41, 0.0 }
  0xe1   : > { %v705_v52 = vmul.f32 %v1831_v27, %v672_v14  ;;  %vm728_vm5 = vcmp.gt.f32.partialorder %v712_v8, 0.0  ;;  %v744_v16 = vmul.f32 0.2, %v712_v8  ;;  %v392_v59 = vmul.f32 %v1802_v6, %v327_v46 }
  0xe2   : > { %963 = vmatmul.mubr.bf16.vlgmr.msra.gmra.mxu1 %v778_v58  ;;  %v768_v21 = vsel %vm736_vm6, %v720_v41, %v752_v56 }
  0xe3   : > { %v721_v15 = vadd.f32 %v705_v52, %v621_v50  ;;  %972 = vmatprep.mubr.bf16.mxu1 %v1549_v1  ;;  %v760_v48 = vsel %vm728_vm5, %v712_v8, %v744_v16  ;;  %v414_v63 = vadd.f32 %v1813_v13, %v392_v59 }
  0xe4   : > { %v367_v18 = vpop.permute.xlu1 %366  ;;  %v775_v20 = vpack.c.bf16 %v761_v17, %v760_v48  ;;  %v644_v32 = vpop.permute.xlu0 %643 }
  0xe5   : > { %vm737_vm7 = vcmp.gt.f32.partialorder %v721_v15, 0.0  ;;  %v753_v5 = vmul.f32 0.2, %v721_v15  ;;  %v514_v35 = vadd.f32 %v498_v28, %v414_v63  ;;  %v698_v40 = vmul.f32 %v1831_v27, %v644_v32 }
  0xe6   : > { %933 = vmatmul.mubr.bf16.gmra.mxu0 %v775_v20  ;;  %v400_v49 = vmul.f32 %v1802_v6, %v367_v18  ;;  %v395_v28 = vmul.f32 %v1802_v6, %v1769_v45  ;;  %v500_v45 = vmul.f32 %v1807_v9, %v1788_v60 }
  0xe7   : > { %v769_v51 = vsel %vm737_vm7, %v721_v15, %v753_v5  ;;  %942 = vmatprep.mubr.bf16.mxu0 %v1549_v1 }
  0xe8   : > { %v779_v22 = vpack.c.bf16 %v769_v51, %v768_v21  ;;  %v372_v25 = vpop.permute.xlu1 %371  ;;  %v680_v44 = vpop.permute.xlu0 %679  ;;  %v422_v41 = vadd.f32 %v1813_v13, %v400_v49 }
  0xe9   : > { %v401_v29 = vmul.f32 %v1802_v6, %v372_v25  ;;  %v707_v57 = vmul.f32 %v1831_v27, %v680_v44 }
  0xea   : > { %973 = vmatmul.mubr.bf16.gmra.mxu1 %v779_v22 }
  0xeb   : > { %982 = vmatprep.mubr.bf16.mxu1 %v1549_v1  ;;  %v423_v33 = vadd.f32 %v1813_v13, %v401_v29  ;;  %v417_v29 = vadd.f32 %v1813_v13, %v395_v28 }
  0xed   : > { %v448_v53 = vpop.permute.xlu1 %447  ;;  %v523_v36 = vadd.f32 %v507_v55, %v423_v33 }
  0xee   : > { %v499_v34 = vmul.f32 %v1807_v9, %v448_v53 }
  0xf0   : > { %v515_v23 = vadd.f32 %v499_v34, %v415_v38 }
  0xf1   : > { %v476_v26 = vpop.permute.xlu1 %475 }
  0xf2   : > { %v506_v62 = vmul.f32 %v1807_v9, %v476_v26  ;;  %v615_v14 = vadd.f32 %v599_v47, %v515_v23 }
  0xf4   : > { %v522_v50 = vadd.f32 %v506_v62, %v422_v41 }
  0xf6   : > { %v544_v12 = vpop.permute.xlu1 %543 }
  0xf7   : > { %v598_v31 = vmul.f32 %v1822_v19, %v544_v12 }
  0xf9   : > { %v614_v39 = vadd.f32 %v598_v31, %v514_v35  ;;  %v601_v31 = vmul.f32 %v1822_v19, %v1838_v37 }
  0xfa   : > { %v576_v11 = vpop.permute.xlu1 %575 }
  0xfb   : > { %v714_v54 = vadd.f32 %v698_v40, %v614_v39  ;;  %v606_v8 = vmul.f32 %v1822_v19, %v576_v11  ;;  %v652_v40 = vpop.permute.xlu0 %651 }
  0xfd   : > { %v746_v24 = vmul.f32 0.2, %v714_v54  ;;  %vm730_vm8 = vcmp.gt.f32.partialorder %v714_v54, 0.0  ;;  %v622_v56 = vadd.f32 %v606_v8, %v522_v50 }
  0xfe   : > { %v580_v42 = vpop.permute.xlu1 %579 }
  0xff   : > { %v607_v43 = vmul.f32 %v1822_v19, %v580_v42  ;;  %v762_v18 = vsel %vm730_vm8, %v714_v54, %v746_v24  ;;  %v688_v60 = vpop.permute.xlu0 %687 }
 0x100   : > { %v709_v8 = vmul.f32 %v1831_v27, %v688_v60 }
 0x101   : > { %v623_v2 = vadd.f32 %v607_v43, %v523_v36  ;;  %v509_v43 = vmul.f32 %v1807_v9, %v1795_v0  ;;  %v700_v36 = vmul.f32 %v1831_v27, %v652_v40 }
 0x103   : > { %v648_v7 = vpop.permute.xlu1 %647  ;;  %v723_v52 = vadd.f32 %v707_v57, %v623_v2 }
 0x104   : > { %v699_v58 = vmul.f32 %v1831_v27, %v648_v7 }
 0x105   : > { %v755_v17 = vmul.f32 0.2, %v723_v52  ;;  %vm739_vm10 = vcmp.gt.f32.partialorder %v723_v52, 0.0 }
 0x106   : > { %v715_v46 = vadd.f32 %v699_v58, %v615_v14 }
 0x107   : > { %v676_v16 = vpop.permute.xlu1 %675  ;;  %v771_v53 = vsel %vm739_vm10, %v723_v52, %v755_v17 }
 0x108   : > { %vm731_vm9 = vcmp.gt.f32.partialorder %v715_v46, 0.0  ;;  %v747_v15 = vmul.f32 0.2, %v715_v46  ;;  %v706_v48 = vmul.f32 %v1831_v27, %v676_v16 }
 0x10a   : > { %v722_v5 = vadd.f32 %v706_v48, %v622_v56  ;;  %v763_v20 = vsel %vm731_vm9, %v715_v46, %v747_v15 }
 0x10b   : > { %v776_v21 = vpack.c.bf16 %v763_v20, %v762_v18 }
 0x10c   : > { %vm738_vm11 = vcmp.gt.f32.partialorder %v722_v5, 0.0  ;;  %v754_v51 = vmul.f32 0.2, %v722_v5  ;;  %v337_v22 = vpop.permute.xlu1 %336 }
 0x10d   : > { %943 = vmatmul.mubr.bf16.gmra.mxu0 %v776_v21  ;;  %v394_v34 = vmul.f32 %v1802_v6, %v337_v22  ;;  %v1099_v21 = vld [vmem:[%s2082_s5] sm:$0x3] }
 0x10e   : > { %v770_v25 = vsel %vm738_vm11, %v722_v5, %v754_v51  ;;  %952 = vmatprep.mubr.bf16.mxu0 %v1549_v1  ;;  %v1100_v51 = vunpack.c.l.bf16 %v1099_v21 }
 0x10f   : > { %v780_v26 = vpack.c.bf16 %v771_v53, %v770_v25 }
 0x110   : > { %v377_v59 = vpop.permute.xlu1 %376  ;;  %v1109_v53 = vrot.slane %v1100_v51, %v592_v10 }
 0x111   : > { %983 = vmatmul.mubr.bf16.gmra.mxu1 %v780_v26  ;;  %v402_v23 = vmul.f32 %v1802_v6, %v377_v59  ;;  %v1105_v59 = vrot.slane %v1100_v51, %v1798_v3 }
 0x112   : > { %992 = vmatprep.mubr.bf16.mxu1 %v1549_v1  ;;  %v416_v1 = vadd.f32 %v1813_v13, %v394_v34 }
 0x113   : > { %v424_v41 = vadd.f32 %v1813_v13, %v402_v23 }
 0x114   : > { %v382_v12 = vpop.permute.xlu1 %381  ;;  %v516_v37 = vadd.f32 %v500_v45, %v416_v1 }
 0x115   : > { %v403_v38 = vmul.f32 %v1802_v6, %v382_v12 }
 0x117   : > { %v425_v42 = vadd.f32 %v1813_v13, %v403_v38 }
 0x119   : > { %v456_v63 = vpop.permute.xlu1 %455  ;;  %v525_v62 = vadd.f32 %v509_v43, %v425_v42 }
 0x11a   : > { %v501_v30 = vmul.f32 %v1807_v9, %v456_v63 }
 0x11c   : > { %v517_v11 = vadd.f32 %v501_v30, %v417_v29 }
 0x11d   : > { %v484_v32 = vpop.permute.xlu1 %483 }
 0x11e   : > { %v617_v33 = vadd.f32 %v601_v31, %v517_v11  ;;  %v508_v54 = vmul.f32 %v1807_v9, %v484_v32  ;;  %v1943_v11 = vrot.slane %v1105_v59, %v1798_v3 }
 0x120   : > { %v524_v58 = vadd.f32 %v508_v54, %v424_v41 }
 0x122   : > { %v552_v35 = vpop.permute.xlu1 %551 }
 0x123   : > { %v600_v55 = vmul.f32 %v1822_v19, %v552_v35 }
 0x125   : > { %v616_v44 = vadd.f32 %v600_v55, %v516_v37 }
 0x126   : > { %v584_v39 = vpop.permute.xlu1 %583 }
 0x127   : > { %v716_v2 = vadd.f32 %v700_v36, %v616_v44  ;;  %v608_v0 = vmul.f32 %v1822_v19, %v584_v39 }
 0x129   : > { %v748_v50 = vmul.f32 0.2, %v716_v2  ;;  %vm732_vm12 = vcmp.gt.f32.partialorder %v716_v2, 0.0  ;;  %v624_v46 = vadd.f32 %v608_v0, %v524_v58 }
 0x12a   : > { %v588_v47 = vpop.permute.xlu1 %587 }
 0x12b   : > { %v609_v49 = vmul.f32 %v1822_v19, %v588_v47  ;;  %v764_v13 = vsel %vm732_vm12, %v716_v2, %v748_v50 }
 0x12d   : > { %v625_v57 = vadd.f32 %v609_v49, %v525_v62 }
 0x12f   : > { %v656_v7 = vpop.permute.xlu1 %655  ;;  %v725_v6 = vadd.f32 %v709_v8, %v625_v57 }
 0x130   : > { %v701_v14 = vmul.f32 %v1831_v27, %v656_v7 }
 0x131   : > { %v757_v56 = vmul.f32 0.2, %v725_v6  ;;  %vm741_vm14 = vcmp.gt.f32.partialorder %v725_v6, 0.0 }
 0x132   : > { %v717_v24 = vadd.f32 %v701_v14, %v617_v33 }
 0x133   : > { %v684_v52 = vpop.permute.xlu1 %683  ;;  %v773_v18 = vsel %vm741_vm14, %v725_v6, %v757_v56 }
 0x134   : > { %vm733_vm13 = vcmp.gt.f32.partialorder %v717_v24, 0.0  ;;  %v749_v9 = vmul.f32 0.2, %v717_v24  ;;  %v708_v16 = vmul.f32 %v1831_v27, %v684_v52  ;;  %v798_v27 = vld [vmem:[%s2081_s4] sm:$0x3] }
 0x135   : > { %v1931_v22 = vrot.slane %v798_v27, %v1798_v3  ;;  %v1935_v25 = vrot.slane %v798_v27, %v492_v4  ;;  %v1946_v4 = vrot.slane %v1109_v53, %v1798_v3 }
 0x136   : > { %v724_v15 = vadd.f32 %v708_v16, %v624_v46  ;;  %v765_v48 = vsel %vm733_vm13, %v717_v24, %v749_v9 }
 0x137   : > { %v777_v17 = vpack.c.bf16 %v765_v48, %v764_v13 }
 0x138   : > { %vm740_vm15 = vcmp.gt.f32.partialorder %v724_v15, 0.0  ;;  %v756_v19 = vmul.f32 0.2, %v724_v15 }
 0x139   : > { %953 = vmatmul.mubr.bf16.gmra.mxu0 %v777_v17 }
 0x13a   : > { %v772_v5 = vsel %vm740_vm15, %v724_v15, %v756_v19 }
 0x13b   : > { %v781_v20 = vpack.c.bf16 %v773_v18, %v772_v5 }
 0x13d   : > { %993 = vmatmul.mubr.bf16.gmra.mxu1 %v781_v20 }
 0x19e   : > { %v924_v26 = vpop.f32.mrf.mxu0 }
 0x19f   : > { %v925_v12 = vadd.f32 %v924_v26, %v1931_v22 }
 0x1a0   : > { %v926_v28 = vpop.f32.mrf.mxu0 }
 0x1a1   : > { %vm1003_vm0 = vcmp.gt.f32.partialorder %v925_v12, 0.0  ;;  %v1035_v63 = vmul.f32 0.2, %v925_v12  ;;  %v927_v29 = vadd.f32 %v926_v28, %v1935_v25 }
 0x1a2   : > { %v928_v30 = vpop.f32.mrf.mxu0  ;;  %v964_v31 = vpop.f32.mrf.mxu1 }
 0x1a3   : > { %vm1004_vm1 = vcmp.gt.f32.partialorder %v927_v29, 0.0  ;;  %v1036_v61 = vmul.f32 0.2, %v927_v29  ;;  %v929_v10 = vadd.f32 %v928_v30, %v1931_v22  ;;  %v965_v32 = vadd.f32 %v964_v31, %v1931_v22 }
 0x1a4   : > { %v930_v33 = vpop.f32.mrf.mxu0  ;;  %v966_v34 = vpop.f32.mrf.mxu1  ;;  %v1067_v35 = vsel %vm1003_vm0, %v925_v12, %v1035_v63 }
 0x1a5   : > { %vm1005_vm2 = vcmp.gt.f32.partialorder %v929_v10, 0.0  ;;  %v1037_v1 = vmul.f32 0.2, %v929_v10  ;;  %vm1019_vm3 = vcmp.gt.f32.partialorder %v965_v32, 0.0  ;;  %v1051_v38 = vmul.f32 0.2, %v965_v32 }
 0x1a6   : > { %v931_v45 = vadd.f32 %v930_v33, %v1935_v25  ;;  %v967_v55 = vadd.f32 %v966_v34, %v1935_v25  ;;  %v968_v39 = vpop.f32.mrf.mxu1  ;;  %v1068_v3 = vsel %vm1004_vm1, %v927_v29, %v1036_v61  ;;  %v1120_v40 = vmul.f32 %v1943_v11, %v1067_v35  ;;  %v934_v42 = vpop.f32.mrf.mxu0 }
 0x1a7   : > { %v969_v37 = vadd.f32 %v968_v39, %v1931_v22  ;;  %v1121_v43 = vmul.f32 %v1946_v4, %v1068_v3  ;;  %v1083_v44 = vsel %vm1019_vm3, %v965_v32, %v1051_v38  ;;  %v1069_v47 = vsel %vm1005_vm2, %v929_v10, %v1037_v1 }
 0x1a8   : > { %vm1006_vm4 = vcmp.gt.f32.partialorder %v931_v45, 0.0  ;;  %v1038_v49 = vmul.f32 0.2, %v931_v45  ;;  %vm1020_vm5 = vcmp.gt.f32.partialorder %v967_v55, 0.0  ;;  %v1052_v23 = vmul.f32 0.2, %v967_v55  ;;  %v970_v36 = vpop.f32.mrf.mxu1  ;;  %v936_v54 = vpop.f32.mrf.mxu0 }
 0x1a9   : > { %v935_v62 = vadd.f32 %v934_v42, %v1931_v22  ;;  %vm1021_vm6 = vcmp.gt.f32.partialorder %v969_v37, 0.0  ;;  %v1053_v60 = vmul.f32 0.2, %v969_v37  ;;  %v971_v2 = vadd.f32 %v970_v36, %v1935_v25 }
 0x1aa   : > { %v937_v57 = vadd.f32 %v936_v54, %v1935_v25  ;;  %v1152_v7 = vadd.f32 %v1121_v43, %v1120_v40  ;;  %v974_v41 = vpop.f32.mrf.mxu1  ;;  %v1084_v8 = vsel %vm1020_vm5, %v967_v55, %v1052_v23  ;;  %v1136_v0 = vmul.f32 %v1943_v11, %v1083_v44  ;;  %v938_v50 = vpop.f32.mrf.mxu0 }
 0x1ab   : > { %vm1007_vm7 = vcmp.gt.f32.partialorder %v935_v62, 0.0  ;;  %v1039_v14 = vmul.f32 0.2, %v935_v62  ;;  %vm1022_vm8 = vcmp.gt.f32.partialorder %v971_v2, 0.0  ;;  %v1054_v58 = vmul.f32 0.2, %v971_v2 }
 0x1ac   : > { %vm1008_vm9 = vcmp.gt.f32.partialorder %v937_v57, 0.0  ;;  %v1040_v6 = vmul.f32 0.2, %v937_v57  ;;  %1153 = vadd.xlane.f32.xlu1 %v1152_v7  ;;  %v939_v24 = vadd.f32 %v938_v50, %v1931_v22  ;;  %v975_v52 = vadd.f32 %v974_v41, %v1931_v22  ;;  %v976_v46 = vpop.f32.mrf.mxu1  ;;  %v940_v9 = vpop.f32.mrf.mxu0 }
 0x1ad   : > { %v977_v16 = vadd.f32 %v976_v46, %v1935_v25  ;;  %v1137_v56 = vmul.f32 %v1946_v4, %v1084_v8  ;;  %v1085_v15 = vsel %vm1021_vm6, %v969_v37, %v1053_v60  ;;  %v1086_v13 = vsel %vm1022_vm8, %v971_v2, %v1054_v58 }
 0x1ae   : > { %vm1009_vm10 = vcmp.gt.f32.partialorder %v939_v24, 0.0  ;;  %v1041_v48 = vmul.f32 0.2, %v939_v24  ;;  %vm1023_vm11 = vcmp.gt.f32.partialorder %v975_v52, 0.0  ;;  %v1055_v17 = vmul.f32 0.2, %v975_v52  ;;  %v978_v19 = vpop.f32.mrf.mxu1 }
 0x1af   : > { %v941_v5 = vadd.f32 %v940_v9, %v1935_v25  ;;  %vm1024_vm12 = vcmp.gt.f32.partialorder %v977_v16, 0.0  ;;  %v1056_v18 = vmul.f32 0.2, %v977_v16  ;;  %v1176_v20 = vadd.f32 %v1137_v56, %v1136_v0 }
 0x1b0   : > { %v979_v21 = vadd.f32 %v978_v19, %v1931_v22  ;;  %v980_v27 = vpop.f32.mrf.mxu1  ;;  %v1138_v51 = vmul.f32 %v1943_v11, %v1085_v15  ;;  %v1139_v53 = vmul.f32 %v1946_v4, %v1086_v13  ;;  %v1070_v26 = vsel %vm1006_vm4, %v931_v45, %v1038_v49 }
 0x1b1   : > { %vm1010_vm13 = vcmp.gt.f32.partialorder %v941_v5, 0.0  ;;  %v1042_v59 = vmul.f32 0.2, %v941_v5  ;;  %1177 = vadd.xlane.f32.xlu0 %v1176_v20  ;;  %v981_v12 = vadd.f32 %v980_v27, %v1935_v25  ;;  %v1122_v28 = vmul.f32 %v1943_v11, %v1069_v47 }
 0x1b2   : > { %vm1025_vm14 = vcmp.gt.f32.partialorder %v979_v21, 0.0  ;;  %v1057_v63 = vmul.f32 0.2, %v979_v21  ;;  %v1179_v29 = vadd.f32 %v1139_v53, %v1138_v51  ;;  %v1123_v30 = vmul.f32 %v1946_v4, %v1070_v26 }
 0x1b3   : > { %vm1026_vm15 = vcmp.gt.f32.partialorder %v981_v12, 0.0  ;;  %v1058_v31 = vmul.f32 0.2, %v981_v12  ;;  %v1073_v61 = vsel %vm1009_vm10, %v939_v24, %v1041_v48  ;;  %v1074_v10 = vsel %vm1010_vm13, %v941_v5, %v1042_v59 }
 0x1b4   : > { %1180 = vadd.xlane.f32.xlu1 %v1179_v29  ;;  %v1155_v32 = vadd.f32 %v1123_v30, %v1122_v28  ;;  %v1126_v33 = vmul.f32 %v1943_v11, %v1073_v61  ;;  %v1127_v34 = vmul.f32 %v1946_v4, %v1074_v10  ;;  %v1071_v35 = vsel %vm1007_vm7, %v935_v62, %v1039_v14 }
 0x1b5   : > { %v1072_v1 = vsel %vm1008_vm9, %v937_v57, %v1040_v6  ;;  %v1124_v38 = vmul.f32 %v1943_v11, %v1071_v35  ;;  %v1089_v45 = vsel %vm1025_vm14, %v979_v21, %v1057_v63  ;;  %v1090_v55 = vsel %vm1026_vm15, %v981_v12, %v1058_v31 }
 0x1b6   : > { %1156 = vadd.xlane.f32.xlu0 %v1155_v32  ;;  %v1161_v39 = vadd.f32 %v1127_v34, %v1126_v33  ;;  %v1125_v3 = vmul.f32 %v1946_v4, %v1072_v1  ;;  %v1142_v40 = vmul.f32 %v1943_v11, %v1089_v45  ;;  %v1143_v42 = vmul.f32 %v1946_v4, %v1090_v55 }
 0x1b7   : > { %v1087_v37 = vsel %vm1023_vm11, %v975_v52, %v1055_v17  ;;  %v1088_v43 = vsel %vm1024_vm12, %v977_v16, %v1056_v18 }
 0x1b8   : > { %1162 = vadd.xlane.f32.xlu1 %v1161_v39  ;;  %v1158_v44 = vadd.f32 %v1125_v3, %v1124_v38  ;;  %v1185_v47 = vadd.f32 %v1143_v42, %v1142_v40  ;;  %v1141_v49 = vmul.f32 %v1946_v4, %v1088_v43  ;;  %v1140_v23 = vmul.f32 %v1943_v11, %v1087_v37 }
 0x1ba   : > { %1159 = vadd.xlane.f32.xlu0 %v1158_v44  ;;  %v1182_v36 = vadd.f32 %v1141_v49, %v1140_v23 }
 0x1bc   : > { %1186 = vadd.xlane.f32.xlu1 %v1185_v47 }
 0x1be   : > { %1183 = vadd.xlane.f32.xlu0 %v1182_v36 }
 0x1cd   : > { %v944_v62 = vpop.f32.mrf.mxu0 }
 0x1ce   : > { %v945_v60 = vadd.f32 %v944_v62, %v1931_v22 }
 0x1cf   : > { %v946_v54 = vpop.f32.mrf.mxu0 }
 0x1d0   : > { %vm1011_vm0 = vcmp.gt.f32.partialorder %v945_v60, 0.0  ;;  %v1043_v2 = vmul.f32 0.2, %v945_v60  ;;  %v947_v57 = vadd.f32 %v946_v54, %v1935_v25 }
 0x1d1   : > { %v948_v7 = vpop.f32.mrf.mxu0  ;;  %v984_v41 = vpop.f32.mrf.mxu1 }
 0x1d2   : > { %vm1012_vm1 = vcmp.gt.f32.partialorder %v947_v57, 0.0  ;;  %v1044_v8 = vmul.f32 0.2, %v947_v57  ;;  %v949_v0 = vadd.f32 %v948_v7, %v1931_v22  ;;  %v985_v14 = vadd.f32 %v984_v41, %v1931_v22 }
 0x1d3   : > { %v950_v58 = vpop.f32.mrf.mxu0  ;;  %v986_v50 = vpop.f32.mrf.mxu1  ;;  %v1075_v6 = vsel %vm1011_vm0, %v945_v60, %v1043_v2  ;;  %vm1303_vm0 = vcmask 7168  }
 0x1d4   : > { %vm1013_vm2 = vcmp.gt.f32.partialorder %v949_v0, 0.0  ;;  %v1045_v24 = vmul.f32 0.2, %v949_v0  ;;  %vm1027_vm3 = vcmp.gt.f32.partialorder %v985_v14, 0.0  ;;  %v1059_v52 = vmul.f32 0.2, %v985_v14 }
 0x1d5   : > { %v951_v46 = vadd.f32 %v950_v58, %v1935_v25  ;;  %v987_v9 = vadd.f32 %v986_v50, %v1935_v25  ;;  %v988_v16 = vpop.f32.mrf.mxu1  ;;  %v1076_v56 = vsel %vm1012_vm1, %v947_v57, %v1044_v8  ;;  %v1128_v15 = vmul.f32 %v1943_v11, %v1075_v6 }
 0x1d6   : > { %v989_v13 = vadd.f32 %v988_v16, %v1931_v22  ;;  %v1129_v48 = vmul.f32 %v1946_v4, %v1076_v56  ;;  %v1077_v17 = vsel %vm1013_vm2, %v949_v0, %v1045_v24  ;;  %v1091_v19 = vsel %vm1027_vm3, %v985_v14, %v1059_v52 }
 0x1d7   : > { %vm1014_vm4 = vcmp.gt.f32.partialorder %v951_v46, 0.0  ;;  %v1046_v5 = vmul.f32 0.2, %v951_v46  ;;  %vm1028_vm5 = vcmp.gt.f32.partialorder %v987_v9, 0.0  ;;  %v1060_v18 = vmul.f32 0.2, %v987_v9  ;;  %v990_v20 = vpop.f32.mrf.mxu1 }
 0x1d8   : > { %vm1029_vm6 = vcmp.gt.f32.partialorder %v989_v13, 0.0  ;;  %v1061_v21 = vmul.f32 0.2, %v989_v13  ;;  %v991_v27 = vadd.f32 %v990_v20, %v1935_v25  ;;  %v1164_v51 = vadd.f32 %v1129_v48, %v1128_v15  ;;  %v2017_v20 = vld [vmem:[#allocation2] ss:$0 sm:$0xff] }
 0x1d9   : > { %v1078_v53 = vsel %vm1014_vm4, %v951_v46, %v1046_v5  ;;  %v1130_v26 = vmul.f32 %v1943_v11, %v1077_v17  ;;  %v1092_v59 = vsel %vm1028_vm5, %v987_v9, %v1060_v18  ;;  %v1144_v12 = vmul.f32 %v1943_v11, %v1091_v19 }
 0x1da   : > { %vm1030_vm7 = vcmp.gt.f32.partialorder %v991_v27, 0.0  ;;  %v1062_v28 = vmul.f32 0.2, %v991_v27  ;;  %1165 = vadd.xlane.f32.xlu0 %v1164_v51  ;;  %v1131_v63 = vmul.f32 %v1946_v4, %v1078_v53  ;;  %v1145_v29 = vmul.f32 %v1946_v4, %v1092_v59 }
 0x1db   : > { %v1093_v30 = vsel %vm1029_vm6, %v989_v13, %v1061_v21 }
 0x1dc   : > { %v1167_v31 = vadd.f32 %v1131_v63, %v1130_v26  ;;  %v1188_v61 = vadd.f32 %v1145_v29, %v1144_v12  ;;  %v1094_v10 = vsel %vm1030_vm7, %v991_v27, %v1062_v28  ;;  %v1146_v32 = vmul.f32 %v1943_v11, %v1093_v30 }
 0x1dd   : > { %v1147_v33 = vmul.f32 %v1946_v4, %v1094_v10 }
 0x1de   : > { %1168 = vadd.xlane.f32.xlu1 %v1167_v31  ;;  %1189 = vadd.xlane.f32.xlu0 %v1188_v61 }
 0x1df   : > { %v1191_v34 = vadd.f32 %v1147_v33, %v1146_v32 }
 0x1e2   : > { %1192 = vadd.xlane.f32.xlu1 %v1191_v34 }
 0x1f9   : > { %v954_v35 = vpop.f32.mrf.mxu0 }
 0x1fa   : > { %v955_v1 = vadd.f32 %v954_v35, %v1931_v22 }
 0x1fb   : > { %v956_v38 = vpop.f32.mrf.mxu0 }
 0x1fc   : > { %vm1015_vm8 = vcmp.gt.f32.partialorder %v955_v1, 0.0  ;;  %v1047_v45 = vmul.f32 0.2, %v955_v1  ;;  %v957_v55 = vadd.f32 %v956_v38, %v1935_v25 }
 0x1fd   : > { %v958_v39 = vpop.f32.mrf.mxu0  ;;  %v994_v3 = vpop.f32.mrf.mxu1 }
 0x1fe   : > { %vm1016_vm9 = vcmp.gt.f32.partialorder %v957_v55, 0.0  ;;  %v1048_v40 = vmul.f32 0.2, %v957_v55  ;;  %v959_v42 = vadd.f32 %v958_v39, %v1931_v22  ;;  %v995_v37 = vadd.f32 %v994_v3, %v1931_v22 }
 0x1ff   : > { %v960_v43 = vpop.f32.mrf.mxu0  ;;  %v996_v44 = vpop.f32.mrf.mxu1  ;;  %v1079_v47 = vsel %vm1015_vm8, %v955_v1, %v1047_v45 }
 0x200   : > { %vm1017_vm10 = vcmp.gt.f32.partialorder %v959_v42, 0.0  ;;  %v1049_v49 = vmul.f32 0.2, %v959_v42  ;;  %vm1031_vm11 = vcmp.gt.f32.partialorder %v995_v37, 0.0  ;;  %v1063_v23 = vmul.f32 0.2, %v995_v37 }
 0x201   : > { %v961_v36 = vadd.f32 %v960_v43, %v1935_v25  ;;  %v997_v62 = vadd.f32 %v996_v44, %v1935_v25  ;;  %v998_v60 = vpop.f32.mrf.mxu1  ;;  %v1080_v54 = vsel %vm1016_vm9, %v957_v55, %v1048_v40  ;;  %v1132_v2 = vmul.f32 %v1943_v11, %v1079_v47 }
 0x202   : > { %v999_v57 = vadd.f32 %v998_v60, %v1931_v22  ;;  %v1133_v7 = vmul.f32 %v1946_v4, %v1080_v54  ;;  %v1081_v41 = vsel %vm1017_vm10, %v959_v42, %v1049_v49  ;;  %v1095_v8 = vsel %vm1031_vm11, %v995_v37, %v1063_v23 }
 0x203   : > { %vm1018_vm12 = vcmp.gt.f32.partialorder %v961_v36, 0.0  ;;  %v1050_v0 = vmul.f32 0.2, %v961_v36  ;;  %vm1032_vm13 = vcmp.gt.f32.partialorder %v997_v62, 0.0  ;;  %v1064_v14 = vmul.f32 0.2, %v997_v62  ;;  %v1000_v58 = vpop.f32.mrf.mxu1 }
 0x204   : > { %vm1033_vm14 = vcmp.gt.f32.partialorder %v999_v57, 0.0  ;;  %v1065_v50 = vmul.f32 0.2, %v999_v57  ;;  %v1001_v6 = vadd.f32 %v1000_v58, %v1935_v25  ;;  %v1170_v24 = vadd.f32 %v1133_v7, %v1132_v2 }
 0x205   : > { %v1082_v52 = vsel %vm1018_vm12, %v961_v36, %v1050_v0  ;;  %v1134_v46 = vmul.f32 %v1943_v11, %v1081_v41  ;;  %v1096_v9 = vsel %vm1032_vm13, %v997_v62, %v1064_v14  ;;  %v1148_v22 = vmul.f32 %v1943_v11, %v1095_v8 }
 0x206   : > { %vm1034_vm15 = vcmp.gt.f32.partialorder %v1001_v6, 0.0  ;;  %v1066_v16 = vmul.f32 0.2, %v1001_v6  ;;  %1171 = vadd.xlane.f32.xlu0 %v1170_v24  ;;  %v1135_v56 = vmul.f32 %v1946_v4, %v1082_v52  ;;  %v1149_v15 = vmul.f32 %v1946_v4, %v1096_v9 }
 0x207   : > { %v1097_v13 = vsel %vm1033_vm14, %v999_v57, %v1065_v50 }
 0x208   : > { %v1173_v48 = vadd.f32 %v1135_v56, %v1134_v46  ;;  %v1194_v17 = vadd.f32 %v1149_v15, %v1148_v22  ;;  %v1098_v19 = vsel %vm1034_vm15, %v1001_v6, %v1066_v16  ;;  %v1150_v25 = vmul.f32 %v1943_v11, %v1097_v13 }
 0x209   : > { %v1151_v5 = vmul.f32 %v1946_v4, %v1098_v19 }
 0x20a   : > { %1174 = vadd.xlane.f32.xlu1 %v1173_v48  ;;  %1195 = vadd.xlane.f32.xlu0 %v1194_v17 }
 0x20b   : > { %v1197_v18 = vadd.f32 %v1151_v5, %v1150_v25 }
 0x20e   : > { %1198 = vadd.xlane.f32.xlu1 %v1197_v18 }
 0x235   : > { %v1154_v21 = vpop.xlane.xlu1 %1153 }
 0x236   : > { %v1207_v27 = vadd.f32 %v2017_v20, %v1154_v21 }
 0x238   : > { %v1223_v51 = vsub.f32 0.0, %v1207_v27 }
 0x23a   : > { %v1239_v53 = vmul.f32 1.442695, %v1223_v51  ;;  %v1178_v26 = vpop.xlane.xlu0 %1177 }
 0x23b   : > { %v1215_v59 = vadd.f32 %v2017_v20, %v1178_v26 }
 0x23c   : > { %1477 = vpow2.f32 %v1239_v53 }
 0x23d   : > { %v1231_v12 = vsub.f32 0.0, %v1215_v59  ;;  %v1181_v28 = vpop.xlane.xlu1 %1180 }
 0x23e   : > { %v1216_v11 = vadd.f32 %v2017_v20, %v1181_v28 }
 0x23f   : > { %v1255_v4 = vmul.f32 1.442695, %v1231_v12  ;;  %v1157_v63 = vpop.xlane.xlu0 %1156 }
 0x240   : > { %v1232_v29 = vsub.f32 0.0, %v1216_v11  ;;  %v1208_v30 = vadd.f32 %v2017_v20, %v1157_v63 }
 0x241   : > { %1479 = vpow2.f32 %v1255_v4  ;;  %v1163_v31 = vpop.xlane.xlu1 %1162 }
 0x242   : > { %v1257_v61 = vmul.f32 1.442695, %v1232_v29  ;;  %v1224_v10 = vsub.f32 0.0, %v1208_v30  ;;  %v1210_v32 = vadd.f32 %v2017_v20, %v1163_v31 }
 0x243   : > { %v1160_v33 = vpop.xlane.xlu0 %1159 }
 0x244   : > { %1481 = vpow2.f32 %v1257_v61  ;;  %v1241_v34 = vmul.f32 1.442695, %v1224_v10  ;;  %v1226_v35 = vsub.f32 0.0, %v1210_v32  ;;  %v1209_v1 = vadd.f32 %v2017_v20, %v1160_v33 }
 0x245   : > { %v1187_v38 = vpop.xlane.xlu1 %1186 }
 0x246   : > { %1483 = vpow2.f32 %v1241_v34  ;;  %v1245_v45 = vmul.f32 1.442695, %v1226_v35  ;;  %v1225_v55 = vsub.f32 0.0, %v1209_v1  ;;  %v1218_v39 = vadd.f32 %v2017_v20, %v1187_v38 }
 0x247   : > { %v1184_v3 = vpop.xlane.xlu0 %1183 }
 0x248   : > { %1485 = vpow2.f32 %v1245_v45  ;;  %v1243_v40 = vmul.f32 1.442695, %v1225_v55  ;;  %v1234_v42 = vsub.f32 0.0, %v1218_v39  ;;  %v1217_v37 = vadd.f32 %v2017_v20, %v1184_v3 }
 0x249   : > { %v1478_v43 = vpop.eup %1477 }
 0x24a   : > { %v1271_v44 = vadd.f32 1.0, %v1478_v43  ;;  %1487 = vpow2.f32 %v1243_v40  ;;  %v1261_v47 = vmul.f32 1.442695, %v1234_v42  ;;  %v1233_v49 = vsub.f32 0.0, %v1217_v37 }
 0x24c   : > { %1489 = vrcp.f32 %v1271_v44  ;;  %v1259_v23 = vmul.f32 1.442695, %v1233_v49 }
 0x24d   : > { %1491 = vpow2.f32 %v1261_v47 }
 0x24e   : > { %v1480_v36 = vpop.eup %1479  ;;  %1493 = vpow2.f32 %v1259_v23 }
 0x24f   : > { %v1279_v62 = vadd.f32 1.0, %v1480_v36 }
 0x251   : > { %v1482_v60 = vpop.eup %1481  ;;  %1495 = vrcp.f32 %v1279_v62 }
 0x252   : > { %v1280_v54 = vadd.f32 1.0, %v1482_v60 }
 0x253   : > { %v1484_v2 = vpop.eup %1483 }
 0x254   : > { %1497 = vrcp.f32 %v1280_v54  ;;  %v1272_v57 = vadd.f32 1.0, %v1484_v2 }
 0x255   : > { %v1486_v7 = vpop.eup %1485 }
 0x256   : > { %1499 = vrcp.f32 %v1272_v57  ;;  %v1274_v41 = vadd.f32 1.0, %v1486_v7 }
 0x257   : > { %v1488_v8 = vpop.eup %1487 }
 0x258   : > { %1501 = vrcp.f32 %v1274_v41  ;;  %v1273_v0 = vadd.f32 1.0, %v1488_v8 }
 0x259   : > { %v1490_v14 = vpop.eup %1489 }
 0x25a   : > { %v1492_v58 = vpop.eup %1491  ;;  %1304 = vst.msk [vmem:[%s2032_s10] sm:$0xff] %vm1303_vm0, %v1490_v14  ;;  %1503 = vrcp.f32 %v1273_v0 }
 0x25b   : > { %v1494_v50 = vpop.eup %1493  ;;  %v1282_v6 = vadd.f32 1.0, %v1492_v58 }
 0x25c   : > { %v1281_v24 = vadd.f32 1.0, %v1494_v50 }
 0x25d   : > { %1505 = vrcp.f32 %v1282_v6 }
 0x25e   : > { %v1496_v52 = vpop.eup %1495  ;;  %1507 = vrcp.f32 %v1281_v24 }
 0x25f   : > { %1312 = vst.msk [vmem:[%s2032_s10 + $0x40] sm:$0xff] %vm1303_vm0, %v1496_v52 }
 0x261   : > { %v1498_v46 = vpop.eup %1497 }
 0x262   : > { %1313 = vst.msk [vmem:[%s2032_s10 + $0x48] sm:$0xff] %vm1303_vm0, %v1498_v46 }
 0x263   : > { %v1500_v9 = vpop.eup %1499  ;;  %v1166_v22 = vpop.xlane.xlu0 %1165 }
 0x264   : > { %1305 = vst.msk [vmem:[%s2032_s10 + $0x8] sm:$0xff] %vm1303_vm0, %v1500_v9  ;;  %v1211_v56 = vadd.f32 %v2017_v20, %v1166_v22 }
 0x265   : > { %v1502_v16 = vpop.eup %1501 }
 0x266   : > { %1307 = vst.msk [vmem:[%s2032_s10 + $0x18] sm:$0xff] %vm1303_vm0, %v1502_v16  ;;  %v1227_v13 = vsub.f32 0.0, %v1211_v56 }
 0x267   : > { %v1504_v15 = vpop.eup %1503  ;;  %v1169_v48 = vpop.xlane.xlu1 %1168 }
 0x268   : > { %1306 = vst.msk [vmem:[%s2032_s10 + $0x10] sm:$0xff] %vm1303_vm0, %v1504_v15  ;;  %v1190_v17 = vpop.xlane.xlu0 %1189  ;;  %v1247_v19 = vmul.f32 1.442695, %v1227_v13  ;;  %v1212_v25 = vadd.f32 %v2017_v20, %v1169_v48 }
 0x269   : > { %v1219_v5 = vadd.f32 %v2017_v20, %v1190_v17 }
 0x26a   : > { %v1506_v18 = vpop.eup %1505  ;;  %1509 = vpow2.f32 %v1247_v19  ;;  %v1228_v27 = vsub.f32 0.0, %v1212_v25 }
 0x26b   : > { %v1508_v21 = vpop.eup %1507  ;;  %1315 = vst.msk [vmem:[%s2032_s10 + $0x58] sm:$0xff] %vm1303_vm0, %v1506_v18  ;;  %v1235_v51 = vsub.f32 0.0, %v1219_v5  ;;  %v1193_v53 = vpop.xlane.xlu1 %1192 }
 0x26c   : > { %1314 = vst.msk [vmem:[%s2032_s10 + $0x50] sm:$0xff] %vm1303_vm0, %v1508_v21  ;;  %v1249_v26 = vmul.f32 1.442695, %v1228_v27  ;;  %v1220_v12 = vadd.f32 %v2017_v20, %v1193_v53 }
 0x26d   : > { %v1263_v59 = vmul.f32 1.442695, %v1235_v51 }
 0x26e   : > { %1511 = vpow2.f32 %v1249_v26  ;;  %v1236_v28 = vsub.f32 0.0, %v1220_v12 }
 0x26f   : > { %1513 = vpow2.f32 %v1263_v59 }
 0x270   : > { %v1265_v11 = vmul.f32 1.442695, %v1236_v28 }
 0x272   : > { %1515 = vpow2.f32 %v1265_v11 }
 0x277   : > { %v1510_v4 = vpop.eup %1509 }
 0x278   : > { %v1275_v63 = vadd.f32 1.0, %v1510_v4 }
 0x27a   : > { %1517 = vrcp.f32 %v1275_v63 }
 0x27b   : > { %v1512_v29 = vpop.eup %1511 }
 0x27c   : > { %v1514_v30 = vpop.eup %1513  ;;  %v1276_v31 = vadd.f32 1.0, %v1512_v29 }
 0x27d   : > { %v1283_v61 = vadd.f32 1.0, %v1514_v30 }
 0x27e   : > { %1519 = vrcp.f32 %v1276_v31 }
 0x27f   : > { %v1516_v10 = vpop.eup %1515  ;;  %1521 = vrcp.f32 %v1283_v61 }
 0x280   : > { %v1284_v32 = vadd.f32 1.0, %v1516_v10 }
 0x282   : > { %1523 = vrcp.f32 %v1284_v32 }
 0x287   : > { %v1518_v33 = vpop.eup %1517 }
 0x288   : > { %1308 = vst.msk [vmem:[%s2032_s10 + $0x20] sm:$0xff] %vm1303_vm0, %v1518_v33 }
 0x28b   : > { %v1520_v34 = vpop.eup %1519 }
 0x28c   : > { %v1522_v35 = vpop.eup %1521  ;;  %1309 = vst.msk [vmem:[%s2032_s10 + $0x28] sm:$0xff] %vm1303_vm0, %v1520_v34 }
 0x28d   : > { %1316 = vst.msk [vmem:[%s2032_s10 + $0x60] sm:$0xff] %vm1303_vm0, %v1522_v35 }
 0x28f   : > { %v1524_v1 = vpop.eup %1523  ;;  %v1172_v38 = vpop.xlane.xlu0 %1171 }
 0x290   : > { %1317 = vst.msk [vmem:[%s2032_s10 + $0x68] sm:$0xff] %vm1303_vm0, %v1524_v1  ;;  %v1213_v45 = vadd.f32 %v2017_v20, %v1172_v38 }
 0x292   : > { %v1229_v55 = vsub.f32 0.0, %v1213_v45 }
 0x293   : > { %v1175_v39 = vpop.xlane.xlu1 %1174  ;;  %v1196_v3 = vpop.xlane.xlu0 %1195 }
 0x294   : > { %v1251_v40 = vmul.f32 1.442695, %v1229_v55  ;;  %v1214_v42 = vadd.f32 %v2017_v20, %v1175_v39  ;;  %v1221_v37 = vadd.f32 %v2017_v20, %v1196_v3 }
 0x296   : > { %1525 = vpow2.f32 %v1251_v40  ;;  %v1230_v43 = vsub.f32 0.0, %v1214_v42  ;;  %v1237_v44 = vsub.f32 0.0, %v1221_v37 }
 0x297   : > { %v1199_v47 = vpop.xlane.xlu1 %1198 }
 0x298   : > { %v1253_v49 = vmul.f32 1.442695, %v1230_v43  ;;  %v1267_v23 = vmul.f32 1.442695, %v1237_v44  ;;  %v1222_v36 = vadd.f32 %v2017_v20, %v1199_v47 }
 0x29a   : > { %1527 = vpow2.f32 %v1253_v49  ;;  %v1238_v62 = vsub.f32 0.0, %v1222_v36 }
 0x29b   : > { %1529 = vpow2.f32 %v1267_v23 }
 0x29c   : > { %v1269_v60 = vmul.f32 1.442695, %v1238_v62 }
 0x29e   : > { %1531 = vpow2.f32 %v1269_v60 }
 0x2a3   : > { %v1526_v54 = vpop.eup %1525 }
 0x2a4   : > { %v1277_v2 = vadd.f32 1.0, %v1526_v54 }
 0x2a6   : > { %1533 = vrcp.f32 %v1277_v2 }
 0x2a7   : > { %v1528_v57 = vpop.eup %1527 }
 0x2a8   : > { %v1530_v7 = vpop.eup %1529  ;;  %v1278_v41 = vadd.f32 1.0, %v1528_v57 }
 0x2a9   : > { %v1285_v8 = vadd.f32 1.0, %v1530_v7 }
 0x2aa   : > { %1535 = vrcp.f32 %v1278_v41 }
 0x2ab   : > { %v1532_v0 = vpop.eup %1531  ;;  %1537 = vrcp.f32 %v1285_v8 }
 0x2ac   : > { %v1286_v20 = vadd.f32 1.0, %v1532_v0 }
 0x2ae   : > { %1539 = vrcp.f32 %v1286_v20 }
 0x2b3   : > { %v1534_v14 = vpop.eup %1533 }
 0x2b4   : > { %1310 = vst.msk [vmem:[%s2032_s10 + $0x30] sm:$0xff] %vm1303_vm0, %v1534_v14 }
 0x2b7   : > { %v1536_v58 = vpop.eup %1535 }
 0x2b8   : > { %v1538_v50 = vpop.eup %1537  ;;  %1311 = vst.msk [vmem:[%s2032_s10 + $0x38] sm:$0xff] %vm1303_vm0, %v1536_v58 }
 0x2b9   : > { %1318 = vst.msk [vmem:[%s2032_s10 + $0x70] sm:$0xff] %vm1303_vm0, %v1538_v50 }
 0x2bb   : > { %v1540_v6 = vpop.eup %1539 }
 0x2bc   : > { %1319 = vst.msk [vmem:[%s2032_s10 + $0x78] sm:$0xff] %vm1303_vm0, %v1540_v6 }
 0x2bd PF: > { %s19_s26 = sadd.s32 1, %s1547_s26  }
 0x2be   : > { %p16_p4 = scmp.ge.s32.totalorder %s19_s26, 4  }
 0x2c0   :  { %18 = sbr.rel (!%p16_p4) target bundleno = 3 (0x3), region = 78 }

</bundles_post_ra>
